<compile_context>
chip_gen: v5e
topology: v5e:2x2
jax: 0.10.0
libtpu: 0.0.40
codegen_flags: <defaults>
</compile_context>

<pallas_src>
import numpy as np
import jax
import jax.numpy as jnp
from jax.experimental import pallas as pl
from jax.experimental.pallas import tpu as pltpu

EMB = 64
NUM_HEADS = 4
MAX_TILE_B = 1024          # rows per grid step at large B (multiple of 8, VMEM-safe)


def _round_up(n, m):
    return ((n + m - 1) // m) * m


# ----------------------------------------------------------------------------
# Pallas kernel: single fused projection (== MHA for seq_len=1, eval mode)
# ----------------------------------------------------------------------------
def selfattention_kernel(omic_ref, histo_ref, a_o_ref, a_h_ref, b_ref, out_ref):
    # out = omic @ A_o + histo @ A_h + b_fused   (A = Wv.T @ Wo.T folded offline)
    out_ref[...] = (
        jnp.dot(omic_ref[...], a_o_ref[...], preferred_element_type=jnp.float32)
        + jnp.dot(histo_ref[...], a_h_ref[...], preferred_element_type=jnp.float32)
        + b_ref[...]
    )


# ----------------------------------------------------------------------------
# One-time weight preparation (outside jit: no per-call relayout / refusion)
# ----------------------------------------------------------------------------
def prepare_params(params, d_omic):
    E = EMB
    wv = params['in_proj_weight'][2 * E:3 * E]        # (E, E): v = x @ wv.T + bv
    bv = params['in_proj_bias'][2 * E:3 * E]
    wo = params['out_proj_weight']                    # (E, E): out = v @ wo.T + bo
    bo = params['out_proj_bias']
    a = wv.T @ wo.T                                   # (E, E) fused weight
    return dict(
        a_o=a[:d_omic],                               # (d_omic, E)  acts on omic
        a_h=a[d_omic:],                               # (d_histo, E) acts on histo
        b=(bv @ wo.T + bo).reshape(1, E),             # (1, E) fused bias
    )


# ----------------------------------------------------------------------------
# Forward: batch-tiled pallas_call, weights resident, batch axis parallel
# ----------------------------------------------------------------------------
def selfattention_forward(omic, histo, prepped):
    B, d_o = omic.shape
    d_h = histo.shape[1]
    tile_b = min(MAX_TILE_B, _round_up(B, 8))         # multiple of 8, capped for VMEM
    grid = (pl.cdiv(B, tile_b),)

    return pl.pallas_call(
        selfattention_kernel,
        out_shape=jax.ShapeDtypeStruct((B, EMB), jnp.float32),
        grid=grid,
        in_specs=[
            pl.BlockSpec((tile_b, d_o), lambda i: (i, 0)),   # omic rows streamed
            pl.BlockSpec((tile_b, d_h), lambda i: (i, 0)),   # histo rows streamed
            pl.BlockSpec((d_o, EMB), lambda i: (0, 0)),      # fused weight (resident)
            pl.BlockSpec((d_h, EMB), lambda i: (0, 0)),      # fused weight (resident)
            pl.BlockSpec((1, EMB), lambda i: (0, 0)),        # fused bias (resident)
        ],
        out_specs=pl.BlockSpec((tile_b, EMB), lambda i: (i, 0)),
        compiler_params=pltpu.CompilerParams(
            dimension_semantics=("parallel",)),              # megacore on v7x
    )(omic, histo, prepped['a_o'], prepped['a_h'], prepped['b'])


# ----------------------------------------------------------------------------
# Deterministic synthetic parameters (PyTorch-shaped MHA params)
# ----------------------------------------------------------------------------
def init_params(key):
    E = EMB
    k1, k2, k3, k4 = jax.random.split(key, 4)
    return dict(
        in_proj_weight=jax.random.normal(k1, (3 * E, E), jnp.float32) / np.sqrt(E),
        in_proj_bias=0.1 * jax.random.normal(k2, (3 * E,), jnp.float32),
        out_proj_weight=jax.random.normal(k3, (E, E), jnp.float32) / np.sqrt(E),
        out_proj_bias=0.1 * jax.random.normal(k4, (E,), jnp.float32),
    )


# ----------------------------------------------------------------------------
# Full multi-head-attention reference (explicit Q/K/V + softmax), pure JAX
# ----------------------------------------------------------------------------
def reference_forward(omic, histo, params, num_heads=NUM_HEADS):
    E = EMB
    x = jnp.concatenate([omic, histo], axis=1)          # (B, E)
    xs = x[None]                                        # (L=1, B, E), batch_first=False
    W, b = params['in_proj_weight'], params['in_proj_bias']
    q = xs @ W[:E].T + b[:E]
    k = xs @ W[E:2 * E].T + b[E:2 * E]
    v = xs @ W[2 * E:].T + b[2 * E:]
    L, B, _ = q.shape
    Dh = E // num_heads
    qh = q.reshape(L, B, num_heads, Dh).transpose(1, 2, 0, 3)   # (B, H, L, Dh)
    kh = k.reshape(L, B, num_heads, Dh).transpose(1, 2, 0, 3)
    vh = v.reshape(L, B, num_heads, Dh).transpose(1, 2, 0, 3)
    scores = jnp.einsum('bhqd,bhkd->bhqk', qh, kh) / np.sqrt(Dh)
    attn = jax.nn.softmax(scores, axis=-1)
    oh = jnp.einsum('bhqk,bhkd->bhqd', attn, vh)
    o = oh.transpose(2, 0, 1, 3).reshape(L, B, E)
    out = o @ params['out_proj_weight'].T + params['out_proj_bias']
    return out[0]                                       # squeeze(0)


if __name__ == "__main__":
    key = jax.random.PRNGKey(0)
    kp, ko, kh = jax.random.split(key, 3)
    params = init_params(kp)

    B, D_OMIC, D_HISTO = 8, 32, 32                      # 32 + 32 = embed_dim 64
    omic = jax.random.normal(ko, (B, D_OMIC), jnp.float32)
    histo = jax.random.normal(kh, (B, D_HISTO), jnp.float32)

    prepped = prepare_params(params, D_OMIC)            # once, outside jit
    run = jax.jit(selfattention_forward)
    out = jax.block_until_ready(run(omic, histo, prepped))

    ref = reference_forward(omic, histo, params)
    if not np.allclose(np.asarray(out), np.asarray(ref), rtol=1e-3, atol=1e-3):
        raise SystemExit("kernel/reference mismatch")

    print("KERNEL_OK")
</pallas_src>

<mosaic_0001>
module attributes {stable_mosaic.version = 11 : i64} {
  func.func @selfattention_kernel(%arg0: i32, %arg1: memref<8x32xf32, #tpu.memory_space<vmem>>, %arg2: memref<8x32xf32, #tpu.memory_space<vmem>>, %arg3: memref<32x64xf32, #tpu.memory_space<vmem>>, %arg4: memref<32x64xf32, #tpu.memory_space<vmem>>, %arg5: memref<1x64xf32, #tpu.memory_space<vmem>>, %arg6: memref<8x64xf32, #tpu.memory_space<vmem>>) attributes {dimension_semantics = [#tpu.dimension_semantics<parallel>], iteration_bounds = array<i64: 1>, scalar_prefetch = 0 : i64, scratch_operands = 0 : i64, tpu.core_type = #tpu.core_type<tc>, window_params = [{transform_indices = @transform_0, window_bounds = array<i64: 8, 32>}, {transform_indices = @transform_1, window_bounds = array<i64: 8, 32>}, {pipeline_mode = #tpu.pipeline_mode<synchronous>, transform_indices = @transform_2, window_bounds = array<i64: 32, 64>}, {pipeline_mode = #tpu.pipeline_mode<synchronous>, transform_indices = @transform_3, window_bounds = array<i64: 32, 64>}, {pipeline_mode = #tpu.pipeline_mode<synchronous>, transform_indices = @transform_4, window_bounds = array<i64: 1, 64>}, {transform_indices = @transform_5, window_bounds = array<i64: 8, 64>}]} {
    %c0 = arith.constant 0 : index
    %c0_0 = arith.constant 0 : index
    %0 = vector.load %arg1[%c0, %c0_0] : memref<8x32xf32, #tpu.memory_space<vmem>>, vector<8x32xf32>
    %c0_1 = arith.constant 0 : index
    %c0_2 = arith.constant 0 : index
    %1 = vector.load %arg3[%c0_1, %c0_2] : memref<32x64xf32, #tpu.memory_space<vmem>>, vector<32x64xf32>
    %cst = arith.constant dense<0.000000e+00> : vector<8x64xf32>
    %2 = tpu.matmul %0, %1, %cst {dimension_numbers = #tpu.dot_dimension_numbers<[1], [0], [0], [1], [0, 0, 1, 1], [], []>} : vector<8x32xf32>, vector<32x64xf32>, vector<8x64xf32> -> vector<8x64xf32>
    %c0_3 = arith.constant 0 : index
    %c0_4 = arith.constant 0 : index
    %3 = vector.load %arg2[%c0_3, %c0_4] : memref<8x32xf32, #tpu.memory_space<vmem>>, vector<8x32xf32>
    %c0_5 = arith.constant 0 : index
    %c0_6 = arith.constant 0 : index
    %4 = vector.load %arg4[%c0_5, %c0_6] : memref<32x64xf32, #tpu.memory_space<vmem>>, vector<32x64xf32>
    %cst_7 = arith.constant dense<0.000000e+00> : vector<8x64xf32>
    %5 = tpu.matmul %3, %4, %cst_7 {dimension_numbers = #tpu.dot_dimension_numbers<[1], [0], [0], [1], [0, 0, 1, 1], [], []>} : vector<8x32xf32>, vector<32x64xf32>, vector<8x64xf32> -> vector<8x64xf32>
    %6 = arith.addf %2, %5 : vector<8x64xf32>
    %c0_8 = arith.constant 0 : index
    %c0_9 = arith.constant 0 : index
    %7 = vector.load %arg5[%c0_8, %c0_9] : memref<1x64xf32, #tpu.memory_space<vmem>>, vector<1x64xf32>
    %8 = vector.broadcast %7 : vector<1x64xf32> to vector<8x64xf32>
    %9 = arith.addf %6, %8 : vector<8x64xf32>
    %c0_10 = arith.constant 0 : index
    %c0_11 = arith.constant 0 : index
    %10 = vector.load %arg6[%c0_10, %c0_11] : memref<8x64xf32, #tpu.memory_space<vmem>>, vector<8x64xf32>
    tpu.vector_store %arg6[%c0_10, %c0_11], %9 {strides = array<i32>} : memref<8x64xf32, #tpu.memory_space<vmem>>, vector<8x64xf32>,
    return
  }
  func.func @transform_0(%arg0: i32) -> (i32, i32) {
    %c0_i32 = arith.constant 0 : i32
    %c0_i32_0 = arith.constant 0 : i32
    return %arg0, %c0_i32 : i32, i32
  }
  func.func @transform_1(%arg0: i32) -> (i32, i32) {
    %c0_i32 = arith.constant 0 : i32
    %c0_i32_0 = arith.constant 0 : i32
    return %arg0, %c0_i32 : i32, i32
  }
  func.func @transform_2(%arg0: i32) -> (i32, i32) {
    %c0_i32 = arith.constant 0 : i32
    %c0_i32_0 = arith.constant 0 : i32
    %c0_i32_1 = arith.constant 0 : i32
    return %c0_i32, %c0_i32_0 : i32, i32
  }
  func.func @transform_3(%arg0: i32) -> (i32, i32) {
    %c0_i32 = arith.constant 0 : i32
    %c0_i32_0 = arith.constant 0 : i32
    %c0_i32_1 = arith.constant 0 : i32
    return %c0_i32, %c0_i32_0 : i32, i32
  }
  func.func @transform_4(%arg0: i32) -> (i32, i32) {
    %c0_i32 = arith.constant 0 : i32
    %c0_i32_0 = arith.constant 0 : i32
    %c0_i32_1 = arith.constant 0 : i32
    return %c0_i32, %c0_i32_0 : i32, i32
  }
  func.func @transform_5(%arg0: i32) -> (i32, i32) {
    %c0_i32 = arith.constant 0 : i32
    %c0_i32_0 = arith.constant 0 : i32
    return %arg0, %c0_i32 : i32, i32
  }
}

</mosaic_0001>

<bundles_post_ra>
// kernel: selfattention_forward.1
= control target key start
LH: loop header
LB: loop body
LE: loop exit
PB: predicated region body
PF: predicated region fallthrough
CT: control target
= control target key end

     0   :  { %10 = vsyncpa [#allocation3], 0  ;;  %s356_s0 = inlined_call_operand.hbm [shape: f32[8,32], index: 0, kind: input, shape index: {}]   ;;  %s357_s1 = inlined_call_operand.hbm [shape: f32[8,32], index: 1, kind: input, shape index: {}]   ;;  %s358_s2 = inlined_call_operand.hbm [shape: f32[32,64], index: 2, kind: input, shape index: {}]   ;;  %s359_s3 = inlined_call_operand.hbm [shape: f32[32,64], index: 3, kind: input, shape index: {}]   ;;  %s360_s4 = inlined_call_operand.vmem [shape: f32[1,64], index: 4, kind: input, shape index: {}]   ;;  %s361_s5 = inlined_call_operand.hbm [shape: f32[8,64], index: 5, kind: output, shape index: {}]  }
   0x1   :  { %11 = vsyncpa [#allocation6], 0 }
   0x2   :  { %12 = vsyncpa [#allocation9], 0  ;;  %s30_s20 = sshll.u32 %s357_s1, 4  ;;  %s31_s20 = int_to_ptr.hbm [resolvable:$true] %s30_s20 }
   0x3   :  { %13 = vsyncpa [#allocation4], 0  ;;  %s301_s21 = smov [#allocation5]   ;;  %s19_s25 = sshll.u32 %s356_s0, 4  ;;  %s20_s25 = int_to_ptr.hbm [resolvable:$true] %s19_s25 }
   0x4   :  { %s32_s22 = sshll.u32 %s301_s21, 4  ;;  %s302_s26 = smov [#allocation2]   ;;  %s33_s22 = int_to_ptr.vmem [resolvable:$true] %s32_s22 }
   0x5   :  { %35 = dma.hbm_to_vmem [thread:$0]  %s31_s20, 128, %s33_s22, [#allocation6]  }
   0x6   :  { %s21_s27 = sshll.u32 %s302_s26, 4  ;;  %s40_s30 = sshll.u32 %s358_s2, 4  ;;  %s22_s27 = int_to_ptr.vmem [resolvable:$true] %s21_s27  ;;  %s41_s30 = int_to_ptr.hbm [resolvable:$true] %s40_s30 }
   0x7   :  { %24 = dma.hbm_to_vmem [thread:$0]  %s20_s25, 128, %s22_s27, [#allocation3]  }
   0x8   :  { %s303_s1 = smov [#allocation7]   ;;  %s53_s9 = sshll.u32 %s359_s3, 4  ;;  %s54_s9 = int_to_ptr.hbm [resolvable:$true] %s53_s9 }
   0x9   :  { %s42_s6 = sshll.u32 %s303_s1, 4  ;;  %s304_s10 = smov 128   ;;  %s43_s6 = int_to_ptr.vmem [resolvable:$true] %s42_s6 }
   0xa   :  { %s305_s0 = smov 8   ;;  %s306_s11 = smov [#allocation8]  }
   0xb   :  { %48 = dma.hbm_to_vmem [thread:$0]  %s41_s30, 512, %s43_s6, [#allocation6], %s304_s10, %s304_s10, %s305_s0  }
   0xc   :  { %s55_s12 = sshll.u32 %s306_s11, 4  ;;  %s56_s12 = int_to_ptr.vmem [resolvable:$true] %s55_s12 }
   0xd   :  { %61 = dma.hbm_to_vmem [thread:$0]  %s54_s9, 512, %s56_s12, [#allocation9], %s304_s10, %s304_s10, %s305_s0  }
   0xe   :  { %293 = dma.done.wait [#allocation3], 128  }
   0xf   :  { %294 = vsyncadd [#allocation3], 4294967168 }
  0x10   :  { %295 = dma.done.wait [#allocation6], 640  }
  0x11   :  { %296 = vsyncadd [#allocation6], 4294966656 }
  0x12   :  { %297 = dma.done.wait [#allocation9], 512  }
  0x13   :  { %298 = vsyncadd [#allocation9], 4294966784  ;;  %v89_v0 = vld [vmem:[#allocation8 + $0x18] sm:$0xff]  ;;  %v88_v2 = vld [vmem:[#allocation8 + $0x10] sm:$0xff]  ;;  %vm90_vm0 = vcmask 261120   ;;  %s307_s13 = smov [#allocation10]  }
  0x14   :  { %v84_v1 = vld [vmem:[#allocation7 + $0x18] sm:$0xff]  ;;  %106 = vmatpush.msra.mxu0 %v89_v0  ;;  %v83_v3 = vld [vmem:[#allocation7 + $0x10] sm:$0xff]  ;;  %v87_v4 = vld [vmem:[#allocation8 + $0x8] sm:$0xff]  ;;  %s149_s14 = sshll.u32 %s307_s13, 4  ;;  %s151_s17 = sshll.u32 %s361_s5, 4  ;;  %vm142_vm1 = vcmask 523264   ;;  %s150_s14 = int_to_ptr.vmem [resolvable:$true] %s149_s14  ;;  %s152_s17 = int_to_ptr.hbm [resolvable:$true] %s151_s17 }
  0x15   :  { %129 = vmatpush.msra.mxu1 %v84_v1  ;;  %v82_v5 = vld [vmem:[#allocation7 + $0x8] sm:$0xff]  ;;  %v86_v6 = vld [vmem:[#allocation8] sm:$0xff]  ;;  %v85_v8 = vld [vmem:[#allocation5] sm:$0xff] }
  0x16   :  { %107 = vmatpush.msra.mxu0 %v88_v2  ;;  %v81_v7 = vld [vmem:[#allocation7] sm:$0xff]  ;;  %v80_v9 = vld [vmem:[#allocation2] sm:$0xff] }
  0x17   :  { %130 = vmatpush.msra.mxu1 %v83_v3  ;;  %v172_v10 = vld [vmem:[%s360_s4] ss:$0 sm:$0xff] }
  0x18   :  { %108 = vmatpush.msra.mxu0 %v87_v4 }
  0x19   :  { %131 = vmatpush.msra.mxu1 %v82_v5 }
  0x1a   :  { %109 = vmatpush.msra.mxu0 %v86_v6 }
  0x1b   :  { %132 = vmatpush.msra.mxu1 %v81_v7  ;;  %163 = vmatmul.msk.f32.vlgmr.msra.gmra.mxu0 %vm90_vm0, %v85_v8 }
  0x1c   :  { %164 = vmatmul.msk.f32.vlgmr.msra.gmra.mxu1 %vm90_vm0, %v80_v9 }
  0x98   :  { %v111_v11 = vpop.f32.mrf.mxu0 }
  0x99   :  { %v134_v12 = vpop.f32.mrf.mxu1 }
  0x9a   :  { %v135_v13 = vadd.f32 %v134_v12, %v111_v11 }
  0x9c   :  { %v141_v14 = vadd.f32 %v172_v10, %v135_v13 }
  0x9e   :  { %143 = vst.msk [vmem:[#allocation10] sm:$0xff] %vm142_vm1, %v141_v14 }
  0x9f   :  { %154 = dma.vmem_to_hbm [thread:$0]  %s150_s14, 128, %s152_s17, [#allocation4]  }
  0xa0   :  { %299 = dma.done.wait [#allocation4], 128  }
  0xa1   :  { %300 = vsyncadd [#allocation4], 4294967168 }
  0xa2   :  { %159 = vsyncpa [#allocation3], 1 }
  0xa3   :  { %160 = vsyncpa [#allocation6], 1 }
  0xa4   :  { %161 = vsyncpa [#allocation9], 1 }
  0xa5   :  { %162 = vsyncpa [#allocation4], 1 }

</bundles_post_ra>
